<compile_context>
chip_gen: v7x
topology: tpu7x:2x2x1
jax: 0.10.0
libtpu: 0.0.40
codegen_flags: <defaults>
</compile_context>

<pallas_src>
import jax
import jax.numpy as jnp
from jax import lax
from jax.experimental import pallas as pl
from jax.experimental.pallas import tpu as pltpu


def _attn_kernel(q_ref, k_ref, v_ref, scale_ref, inv_ref, o_ref):
    # q: (Sq, D), k: (Sk, D), v: (Sk, Dv), scale: (1, Sk), inv: (Sq, 1)
    q = q_ref[...]
    k = k_ref[...]
    v = v_ref[...]

    # qk = query @ key^T  -> (Sq, Sk); contraction expressed directly so no
    # transposed copy of the key tile is materialized.
    qk = lax.dot_general(
        q, k,
        dimension_numbers=(((1,), (1,)), ((), ())),
        preferred_element_type=jnp.float32,
    )

    # scaled_qk = qk / scale1  ->  qk * (1 / scale1), exact reciprocal of one
    # (1, Sk) vreg instead of a full-tile divide.
    inv_scale = pl.reciprocal(scale_ref[...], approx=False)
    scaled = qk * inv_scale

    # Numerically stable softmax over the last dim, with the softmax
    # normalization and the inv_scale_factor row scaling fused into a single
    # (Sq, 1) factor applied with one multiply.
    m = jnp.max(scaled, axis=-1, keepdims=True)
    e = jnp.exp(scaled - m)
    denom = jnp.sum(e, axis=-1, keepdims=True)
    row_scale = inv_ref[...] * pl.reciprocal(denom, approx=False)
    p = e * row_scale

    # out = dropout_qk @ value  -> (Sq, Dv)   (MXU, natural orientation)
    o_ref[...] = jnp.dot(p, v, preferred_element_type=jnp.float32).astype(
        o_ref.dtype
    )


def _attention_2d(q2, k2, v2, scale2, inv2):
    """Single-slab attention: q2 (Sq, D), k2 (Sk, D), v2 (Sk, Dv),
    scale2 (1, Sk), inv2 (Sq, 1)."""
    sq, _ = q2.shape
    _, dv = v2.shape
    # No grid: everything fits in VMEM trivially, so we skip the 1-point grid
    # pipeline bookkeeping entirely and hand the kernel whole VMEM-resident
    # operands. inv2 stays a tiny (Sq, 1) VMEM block (SMEM vector loads are
    # not supported; this is a single masked vld).
    vmem = pltpu.MemorySpace.VMEM
    return pl.pallas_call(
        _attn_kernel,
        out_shape=jax.ShapeDtypeStruct((sq, dv), jnp.float32),
        in_specs=[
            pl.BlockSpec(memory_space=vmem),  # q
            pl.BlockSpec(memory_space=vmem),  # k
            pl.BlockSpec(memory_space=vmem),  # v
            pl.BlockSpec(memory_space=vmem),  # scale1 (1, Sk)
            pl.BlockSpec(memory_space=vmem),  # inv_scale_factor (Sq, 1)
        ],
        out_specs=pl.BlockSpec(memory_space=vmem),
    )(q2, k2, v2, scale2, inv2)


def attention_model(query, key, value, scale1, inv_scale_factor):
    """query: (B, Sq, D), key/value: (B, Sk, D/Dv), scale1: (D,), inv: (B, Sq).

    Keys/values differ per batch element, so each batch element gets its own
    grid-free pallas_call (B == 1 in the module spec)."""
    b, sq, d = query.shape
    _, sk, dv = value.shape
    assert sk == scale1.shape[0], "scale1 broadcast requires Sk == D"

    scale2 = scale1.reshape(1, sk)                  # (1, Sk)
    outs = []
    for i in range(b):
        inv2 = inv_scale_factor[i].reshape(sq, 1)   # (Sq, 1)
        outs.append(_attention_2d(query[i], key[i], value[i], scale2, inv2))
    return jnp.stack(outs, axis=0)                  # (B, Sq, Dv)


def _reference(query, key, value, scale1, inv_scale_factor):
    qk = jnp.einsum("bqd,bkd->bqk", query, key)
    scaled = qk / scale1
    soft = jax.nn.softmax(scaled, axis=-1)
    drop = soft * inv_scale_factor[..., None]
    return jnp.einsum("bqk,bkv->bqv", drop, value)


if __name__ == "__main__":
    key0 = jax.random.PRNGKey(0)
    k1, k2, k3, k4 = jax.random.split(key0, 4)

    Sq, Sk, D = 8, 128, 128   # Sk must equal D for the scale1 broadcast

    query = jax.random.normal(k1, (1, Sq, D), dtype=jnp.float32)
    key_t = jax.random.normal(k2, (1, Sk, D), dtype=jnp.float32)
    value = jax.random.normal(k3, (1, Sk, D), dtype=jnp.float32)
    inv_scale_factor = jax.random.uniform(
        k4, (1, Sq), dtype=jnp.float32, minval=0.5, maxval=1.5
    )

    # Deterministic parameter init, matching torch.nn.Parameter(torch.ones(D)).
    scale1 = jnp.ones((D,), dtype=jnp.float32)
    # TODO(synk): the module's self.dropout is computed in __init__ and never
    # used in forward, so it is intentionally omitted.

    out = attention_model(query, key_t, value, scale1, inv_scale_factor)
    out = jax.block_until_ready(out)

    ref = _reference(query, key_t, value, scale1, inv_scale_factor)
    assert out.shape == (1, Sq, D)
    assert jnp.allclose(out, ref, atol=1e-4, rtol=1e-4)

    print("KERNEL_OK")
</pallas_src>

<mosaic_0001>
module attributes {stable_mosaic.version = 11 : i64} {
  func.func @_attn_kernel(%arg0: memref<8x128xf32, #tpu.memory_space<vmem>>, %arg1: memref<128x128xf32, #tpu.memory_space<vmem>>, %arg2: memref<128x128xf32, #tpu.memory_space<vmem>>, %arg3: memref<1x128xf32, #tpu.memory_space<vmem>>, %arg4: memref<8x1xf32, #tpu.memory_space<vmem>>, %arg5: memref<8x128xf32, #tpu.memory_space<vmem>>) attributes {dimension_semantics = [], scalar_prefetch = 0 : i64, scratch_operands = 0 : i64, tpu.core_type = #tpu.core_type<tc>} {
    %c0 = arith.constant 0 : index
    %c0_0 = arith.constant 0 : index
    %0 = vector.load %arg0[%c0, %c0_0] : memref<8x128xf32, #tpu.memory_space<vmem>>, vector<8x128xf32>
    %c0_1 = arith.constant 0 : index
    %c0_2 = arith.constant 0 : index
    %1 = vector.load %arg1[%c0_1, %c0_2] : memref<128x128xf32, #tpu.memory_space<vmem>>, vector<128x128xf32>
    %c0_3 = arith.constant 0 : index
    %c0_4 = arith.constant 0 : index
    %2 = vector.load %arg2[%c0_3, %c0_4] : memref<128x128xf32, #tpu.memory_space<vmem>>, vector<128x128xf32>
    %cst = arith.constant dense<0.000000e+00> : vector<8x128xf32>
    %3 = tpu.matmul %0, %1, %cst {dimension_numbers = #tpu.dot_dimension_numbers<[1], [1], [0], [0], [0, 0, 1, 0], [], []>} : vector<8x128xf32>, vector<128x128xf32>, vector<8x128xf32> -> vector<8x128xf32>
    %c0_5 = arith.constant 0 : index
    %c0_6 = arith.constant 0 : index
    %4 = vector.load %arg3[%c0_5, %c0_6] : memref<1x128xf32, #tpu.memory_space<vmem>>, vector<1x128xf32>
    %5 = tpu.reciprocal %4 : vector<1x128xf32> -> vector<1x128xf32>
    %6 = vector.broadcast %5 : vector<1x128xf32> to vector<8x128xf32>
    %7 = arith.mulf %3, %6 : vector<8x128xf32>
    %cst_7 = arith.constant dense<0xFF800000> : vector<8xf32>
    %8 = vector.multi_reduction <maximumf>, %7, %cst_7 [1] : vector<8x128xf32> to vector<8xf32>
    %9 = vector.shape_cast %8 : vector<8xf32> to vector<8x1xf32>
    %10 = vector.broadcast %9 : vector<8x1xf32> to vector<8x128xf32>
    %11 = arith.subf %7, %10 : vector<8x128xf32>
    %12 = math.exp %11 : vector<8x128xf32>
    %cst_8 = arith.constant dense<0.000000e+00> : vector<8xf32>
    %13 = vector.multi_reduction <add>, %12, %cst_8 [1] : vector<8x128xf32> to vector<8xf32>
    %14 = vector.shape_cast %13 : vector<8xf32> to vector<8x1xf32>
    %c0_9 = arith.constant 0 : index
    %c0_10 = arith.constant 0 : index
    %15 = vector.load %arg4[%c0_9, %c0_10] : memref<8x1xf32, #tpu.memory_space<vmem>>, vector<8x1xf32>
    %16 = tpu.reciprocal %14 : vector<8x1xf32> -> vector<8x1xf32>
    %17 = arith.mulf %15, %16 : vector<8x1xf32>
    %18 = vector.broadcast %17 : vector<8x1xf32> to vector<8x128xf32>
    %19 = arith.mulf %12, %18 : vector<8x128xf32>
    %cst_11 = arith.constant dense<0.000000e+00> : vector<8x128xf32>
    %20 = tpu.matmul %19, %2, %cst_11 {dimension_numbers = #tpu.dot_dimension_numbers<[1], [0], [0], [1], [0, 0, 1, 1], [], []>} : vector<8x128xf32>, vector<128x128xf32>, vector<8x128xf32> -> vector<8x128xf32>
    %c0_12 = arith.constant 0 : index
    %c0_13 = arith.constant 0 : index
    %21 = vector.load %arg5[%c0_12, %c0_13] : memref<8x128xf32, #tpu.memory_space<vmem>>, vector<8x128xf32>
    tpu.vector_store %arg5[%c0_12, %c0_13], %20 {strides = array<i32>} : memref<8x128xf32, #tpu.memory_space<vmem>>, vector<8x128xf32>,
    return
  }
}

</mosaic_0001>

<bundles_post_ra>
// kernel: tpu_custom_call.1
= control target key start
LH: loop header
LB: loop body
LE: loop exit
PB: predicated region body
PF: predicated region fallthrough
CT: control target
= control target key end

     0   :  { %10 = vsyncpa [#allocation3], 0  ;;  %s605_s0 = inlined_call_operand.vmem [shape: f32[8,128], index: 0, kind: input, shape index: {}]   ;;  %s606_s1 = inlined_call_operand.hbm [shape: f32[128,128], index: 1, kind: input, shape index: {}]   ;;  %s607_s2 = inlined_call_operand.hbm [shape: f32[128,128], index: 2, kind: input, shape index: {}]   ;;  %s608_s3 = inlined_call_operand.vmem [shape: f32[1,128], index: 3, kind: input, shape index: {}]   ;;  %s609_s4 = inlined_call_operand.vmem [shape: f32[8,1], index: 4, kind: input, shape index: {}]   ;;  %s610_s5 = inlined_call_operand.hbm [shape: f32[8,128], index: 5, kind: output, shape index: {}]  }
   0x1   :  { %11 = vsyncpa [#allocation6], 0 }
   0x2   :  { %12 = vsyncpa [#allocation4], 0  ;;  %s505_s18 = smov [#allocation2]   ;;  %s433_s22 = scalar_lea.hbm %s606_s1, 2048 }
   0x3   :  { %s20_s19 = sshll.u32 %s505_s18, 4  ;;  %p434_p0 = scmp.ne.s32.totalorder %s606_s1, %s433_s22  ;;  %s21_s19 = int_to_ptr.vmem [resolvable:$true] %s20_s19 }
   0x4   :  { %p437_p1 = scmp.lt.u32.totalorder %s433_s22, %s606_s1 }
   0x6   :  { %p439_p2 = pnand %p437_p1, %p434_p0 }
   0x8   :  { %442 = shalt.err (!%p439_p2)
}
   0x9   :  { %s443_s27 = scalar_lea.vmem %s21_s19, 2048  ;;  %p448_p4 = scmp.lt.s32.totalorder %s21_s19, %s21_s19 }
   0xa   :  { %p444_p3 = scmp.ne.s32.totalorder %s21_s19, %s443_s27  ;;  %p449_p5 = scmp.lt.s32.totalorder %s443_s27, %s443_s27 }
   0xc   :  { %p450_p6 = por %p449_p5, %p448_p4 }
   0xe   :  { %p451_p7 = pnand %p450_p6, %p444_p3 }
  0x10   :  { %454 = shalt.err (!%p451_p7)
}
  0x11   :  { %s506_s28 = smov 128   ;;  %s507_s29 = smov 8  }
  0x12   :  { %26 = dma.hbm_to_vmem [thread:$0]  %s606_s1, 2048, %s21_s19, [#allocation3], %s506_s28, %s506_s28, %s507_s29  }
  0x13   :  { %s508_s7 = smov [#allocation5]   ;;  %s455_s11 = scalar_lea.hbm %s607_s2, 2048 }
  0x14   :  { %s32_s8 = sshll.u32 %s508_s7, 4  ;;  %p456_p8 = scmp.ne.s32.totalorder %s607_s2, %s455_s11  ;;  %s33_s8 = int_to_ptr.vmem [resolvable:$true] %s32_s8 }
  0x15   :  { %p459_p9 = scmp.lt.u32.totalorder %s455_s11, %s607_s2 }
  0x17   :  { %p461_p10 = pnand %p459_p9, %p456_p8 }
  0x19   :  { %464 = shalt.err (!%p461_p10)
}
  0x1a   :  { %s465_s16 = scalar_lea.vmem %s33_s8, 2048  ;;  %p470_p12 = scmp.lt.s32.totalorder %s33_s8, %s33_s8 }
  0x1b   :  { %p466_p11 = scmp.ne.s32.totalorder %s33_s8, %s465_s16  ;;  %p471_p13 = scmp.lt.s32.totalorder %s465_s16, %s465_s16 }
  0x1d   :  { %p472_p0 = por %p471_p13, %p470_p12 }
  0x1f   :  { %p473_p1 = pnand %p472_p0, %p466_p11 }
  0x21   :  { %476 = shalt.err (!%p473_p1)
}
  0x22   :  { %38 = dma.hbm_to_vmem [thread:$0]  %s607_s2, 2048, %s33_s8, [#allocation6], %s506_s28, %s506_s28, %s507_s29  }
  0x23   :  { %499 = dma.done.wait [#allocation3], 2048  }
  0x24   :  { %500 = vsyncadd [#allocation3], 4294965248 }
  0x25   :  { %501 = dma.done.wait [#allocation6], 2048  }
  0x26   :  { %502 = vsyncadd [#allocation6], 4294965248  ;;  %v509_v0 = vmov 0.0|0.0   ;;  %vm510_vm0 = vmmov 0   ;;  %v511_v1 = vmov 0.0   ;;  %v50_v2 = vld [vmem:[#allocation2] sm:$0xff]  ;;  %v155_v28 = vlaneseq }
  0x27   :  { %368 = vmatprep.subr.bf16.mxu0 %v509_v0  ;;  %330 = vmatprep.mubr.msk.f32.mxu0 %vm510_vm0, %v511_v1  ;;  %v51_v3 = vld [vmem:[#allocation2 + $0x8] sm:$0xff]  ;;  %v52_v5 = vld [vmem:[#allocation2 + $0x10] sm:$0xff]  ;;  %v53_v6 = vld [vmem:[#allocation2 + $0x18] sm:$0xff]  ;;  %v512_v40 = vmov 0   ;;  %s513_s21 = smov [#allocation7]  }
  0x28   :  { %392 = vmatprep.subr.bf16.mxu1 %v509_v0  ;;  %365 = vmatprep.mubr.msk.f32.mxu1 %vm510_vm0, %v511_v1  ;;  %v369_v4 = vpack.c.bf16 %v51_v3, %v50_v2  ;;  %v372_v7 = vpack.c.bf16 %v53_v6, %v52_v5  ;;  %v54_v8 = vld [vmem:[#allocation2 + $0x20] sm:$0xff]  ;;  %v55_v9 = vld [vmem:[#allocation2 + $0x28] sm:$0xff]  ;;  %v56_v11 = vld [vmem:[#allocation2 + $0x30] sm:$0xff]  ;;  %v156_v29 = vshrl.u32 %v155_v28, 7  ;;  %s254_s22 = sshll.u32 %s513_s21, 4  ;;  %s255_s22 = int_to_ptr.vmem [resolvable:$true] %s254_s22 }
  0x29   :  { %v375_v10 = vpack.c.bf16 %v55_v9, %v54_v8  ;;  %v57_v12 = vld [vmem:[#allocation2 + $0x38] sm:$0xff]  ;;  %v58_v14 = vld [vmem:[#allocation2 + $0x40] sm:$0xff]  ;;  %v59_v15 = vld [vmem:[#allocation2 + $0x48] sm:$0xff]  ;;  %425 = vset.pattern.permute.xlu1 %v512_v40  ;;  %426 = vset.pattern.permute.xlu0 %v512_v40  ;;  %s477_s23 = scalar_lea.vmem %s255_s22, 128  ;;  %p482_p3 = scmp.lt.s32.totalorder %s255_s22, %s255_s22 }
  0x2a   :  { %370 = vmatpush3.bf16.xpose.msra.mxu0 %v369_v4  ;;  %v378_v13 = vpack.c.bf16 %v57_v12, %v56_v11  ;;  %v381_v16 = vpack.c.bf16 %v59_v15, %v58_v14  ;;  %v60_v17 = vld [vmem:[#allocation2 + $0x50] sm:$0xff]  ;;  %v61_v18 = vld [vmem:[#allocation2 + $0x58] sm:$0xff]  ;;  %v62_v20 = vld [vmem:[#allocation2 + $0x60] sm:$0xff]  ;;  %v157_v30 = vsub.s32 0, %v156_v29  ;;  %p478_p2 = scmp.ne.s32.totalorder %s255_s22, %s477_s23  ;;  %p483_p4 = scmp.lt.s32.totalorder %s477_s23, %s477_s23 }
  0x2b   :  { %371 = vmatprep.subr.bf16.mxu0 %v509_v0  ;;  %v384_v19 = vpack.c.bf16 %v61_v18, %v60_v17  ;;  %v63_v21 = vld [vmem:[#allocation2 + $0x68] sm:$0xff]  ;;  %v64_v23 = vld [vmem:[#allocation2 + $0x70] sm:$0xff]  ;;  %v65_v24 = vld [vmem:[#allocation2 + $0x78] sm:$0xff] }
  0x2c   :  { %v387_v22 = vpack.c.bf16 %v63_v21, %v62_v20  ;;  %v390_v25 = vpack.c.bf16 %v65_v24, %v64_v23  ;;  %v49_v26 = vld [vmem:[%s605_s0] sm:$0xff]  ;;  %v67_v42 = vld [vmem:[#allocation5 + $0x8] sm:$0xff]  ;;  %v68_v43 = vld [vmem:[#allocation5 + $0x10] sm:$0xff]  ;;  %p484_p5 = por %p483_p4, %p482_p3 }
  0x2d   :  { %v152_v27 = vld [vmem:[%s608_s3] sm:$0x1]  ;;  %v69_v45 = vld [vmem:[#allocation5 + $0x18] sm:$0xff]  ;;  %v71_v48 = vld [vmem:[#allocation5 + $0x28] sm:$0xff] }
  0x2e   :  { %427 = vrcp.f32 %v152_v27  ;;  %v66_v41 = vld [vmem:[#allocation5] sm:$0xff]  ;;  %v396_v46 = vpack.c.bf16 %v69_v45, %v68_v43  ;;  %v72_v50 = vld [vmem:[#allocation5 + $0x30] sm:$0xff]  ;;  %v73_v51 = vld [vmem:[#allocation5 + $0x38] sm:$0xff]  ;;  %p485_p6 = pnand %p484_p5, %p478_p2 }
  0x2f   :  { %v393_v44 = vpack.c.bf16 %v67_v42, %v66_v41  ;;  %v70_v47 = vld [vmem:[#allocation5 + $0x20] sm:$0xff]  ;;  %v402_v52 = vpack.c.bf16 %v73_v51, %v72_v50  ;;  %v75_v54 = vld [vmem:[#allocation5 + $0x48] sm:$0xff]  ;;  %v76_v56 = vld [vmem:[#allocation5 + $0x50] sm:$0xff] }
  0x30   :  { %v399_v49 = vpack.c.bf16 %v71_v48, %v70_v47  ;;  %v74_v53 = vld [vmem:[#allocation5 + $0x40] sm:$0xff]  ;;  %v77_v57 = vld [vmem:[#allocation5 + $0x58] sm:$0xff]  ;;  %v79_v60 = vld [vmem:[#allocation5 + $0x68] sm:$0xff] }
  0x31   :  { %394 = vmatpush3.bf16.msra.mxu1 %v393_v44  ;;  %v405_v55 = vpack.c.bf16 %v75_v54, %v74_v53  ;;  %v408_v58 = vpack.c.bf16 %v77_v57, %v76_v56  ;;  %v78_v59 = vld [vmem:[#allocation5 + $0x60] sm:$0xff]  ;;  %v80_v62 = vld [vmem:[#allocation5 + $0x70] sm:$0xff]  ;;  %v81_v63 = vld [vmem:[#allocation5 + $0x78] sm:$0xff] }
  0x32   :  { %373 = vmatpush3.bf16.xpose.msra.mxu0 %v372_v7  ;;  %395 = vmatprep.subr.bf16.mxu1 %v509_v0  ;;  %v411_v61 = vpack.c.bf16 %v79_v60, %v78_v59  ;;  %v414_v1 = vpack.c.bf16 %v81_v63, %v80_v62  ;;  %v168_v3 = vld [vmem:[%s609_s4] sm:$0xff] }
  0x33   :  { %374 = vmatprep.subr.bf16.mxu0 %v509_v0 }
  0x35   :  { %397 = vmatpush3.bf16.msra.mxu1 %v396_v46 }
  0x36   :  { %398 = vmatprep.subr.bf16.mxu1 %v509_v0 }
  0x38   :  { %v428_v31 = vpop.eup %427 }
  0x39   :  { %v158_v32 = vrot.slane %v428_v31, %v157_v30  ;;  %400 = vmatpush3.bf16.msra.mxu1 %v399_v49 }
  0x3a   :  { %376 = vmatpush3.bf16.xpose.msra.mxu0 %v375_v10  ;;  %401 = vmatprep.subr.bf16.mxu1 %v509_v0 }
  0x3b   :  { %377 = vmatprep.subr.bf16.mxu0 %v509_v0 }
  0x3d   :  { %403 = vmatpush3.bf16.msra.mxu1 %v402_v52 }
  0x3e   :  { %404 = vmatprep.subr.bf16.mxu1 %v509_v0 }
  0x41   :  { %406 = vmatpush3.bf16.msra.mxu1 %v405_v55 }
  0x42   :  { %379 = vmatpush3.bf16.xpose.msra.mxu0 %v378_v13  ;;  %407 = vmatprep.subr.bf16.mxu1 %v509_v0 }
  0x43   :  { %380 = vmatprep.subr.bf16.mxu0 %v509_v0 }
  0x45   :  { %409 = vmatpush3.bf16.msra.mxu1 %v408_v58 }
  0x46   :  { %410 = vmatprep.subr.bf16.mxu1 %v509_v0 }
  0x49   :  { %412 = vmatpush3.bf16.msra.mxu1 %v411_v61 }
  0x4a   :  { %382 = vmatpush3.bf16.xpose.msra.mxu0 %v381_v16  ;;  %413 = vmatprep.subr.bf16.mxu1 %v509_v0 }
  0x4b   :  { %383 = vmatprep.subr.bf16.mxu0 %v509_v0 }
  0x4d   :  { %415 = vmatpush3.bf16.msra.mxu1 %v414_v1 }
  0x52   :  { %385 = vmatpush3.bf16.xpose.msra.mxu0 %v384_v19 }
  0x53   :  { %386 = vmatprep.subr.bf16.mxu0 %v509_v0 }
  0x5a   :  { %388 = vmatpush3.bf16.xpose.msra.mxu0 %v387_v22 }
  0x5b   :  { %389 = vmatprep.subr.bf16.mxu0 %v509_v0 }
  0x62   :  { %391 = vmatpush3.bf16.xpose.msra.mxu0 %v390_v25 }
  0x69   :  { %331 = vmatmul.mubr.f32.vlgmr.msra.gmra.mrb[0].mxu0 %v49_v26 }
 0x13c   :  { %v148_v33 = vpop.f32.mrb[0].mxu0 }
 0x13d   :  { %v160_v34 = vmul.f32 %v158_v32, %v148_v33  ;;  %v332_v35 = vpop.f32.mrb[1].mxu0 }
 0x13f   :  { %161 = vmax.xlane.f32.xlu0 %v160_v34 }
 0x1cc   :  { %v162_v36 = vpop.xlane.xlu0 %161 }
 0x1cd   :  { %v163_v37 = vsub.f32 %v160_v34, %v162_v36 }
 0x1cf   :  { %v164_v38 = vmul.f32 1.442695, %v163_v37 }
 0x1d1   :  { %429 = vpow2.f32 %v164_v38 }
 0x1db   :  { %v430_v39 = vpop.eup %429 }
 0x1dc   :  { %166 = vadd.xlane.f32.xlu0 %v430_v39 }
 0x269   :  { %v167_v2 = vpop.xlane.xlu0 %166 }
 0x26a   :  { %431 = vrcp.f32 %v167_v2 }
 0x274   :  { %v432_v4 = vpop.eup %431 }
 0x275   :  { %v170_v5 = vmul.f32 %v432_v4, %v168_v3 }
 0x277   :  { %173 = vperm.xlu1 %425, %v170_v5  }
 0x2f6   :  { %v174_v6 = vpop.permute.xlu1 %173 }
 0x2f7   :  { %v176_v7 = vmul.f32 %v430_v39, %v174_v6 }
 0x2f9   :  { %366 = vmatmul.mubr.f32.vlgmr.msra.gmra.mrb[0].mxu1 %v176_v7 }
 0x3cc   :  { %v243_v8 = vpop.f32.mrb[0].mxu1 }
 0x3cd   :  { %247 = vst [vmem:[#allocation7] sm:$0xff] %v243_v8  ;;  %v367_v9 = vpop.f32.mrb[1].mxu1 }
 0x3ce   :  { %488 = shalt.err (!%p485_p6)
}
 0x3cf   :  { %s489_s25 = scalar_lea.hbm %s610_s5, 128 }
 0x3d0   :  { %p490_p7 = scmp.ne.s32.totalorder %s610_s5, %s489_s25  ;;  %p493_p8 = scmp.lt.u32.totalorder %s489_s25, %s610_s5 }
 0x3d2   :  { %p495_p9 = pnand %p493_p8, %p490_p7 }
 0x3d4   :  { %498 = shalt.err (!%p495_p9)
}
 0x3d5   :  { %257 = dma.vmem_to_hbm [thread:$0]  %s255_s22, 128, %s610_s5, [#allocation4]  }
 0x3d6   :  { %503 = dma.done.wait [#allocation4], 128  }
 0x3d7   :  { %504 = vsyncadd [#allocation4], 4294967168 }
 0x3d8   :  { %261 = vsyncpa [#allocation3], 1 }
 0x3d9   :  { %262 = vsyncpa [#allocation6], 1 }
 0x3da   :  { %263 = vsyncpa [#allocation4], 1 }

</bundles_post_ra>
